<compile_context>
chip_gen: v5e
topology: v5e:2x2
jax: 0.10.0
libtpu: 0.0.40
codegen_flags: <defaults>
</compile_context>

<pallas_src>
import functools

import jax
import jax.numpy as jnp
from jax.experimental import pallas as pl
from jax.experimental.pallas import tpu as pltpu


def _round_up(x, m):
    return ((x + m - 1) // m) * m


def _actor_kernel(s_ref, w1_ref, b1_ref, w2_ref, b2_ref, w3_ref, b3_ref,
                  o_ref, *, max_action):
    """One batch tile of the 3-layer MLP. Weights are VMEM-resident."""
    # Layer 1: Linear + ReLU (MXU matmul in compute dtype, f32 accumulation).
    a = jnp.dot(s_ref[...], w1_ref[...],
                preferred_element_type=jnp.float32) + b1_ref[...]
    a = jnp.maximum(a, 0.0)
    # Layer 2: Linear + ReLU.
    a = jnp.dot(a.astype(w2_ref.dtype), w2_ref[...],
                preferred_element_type=jnp.float32) + b2_ref[...]
    a = jnp.maximum(a, 0.0)
    # Layer 3: Linear + tanh scaled by max_action (tanh runs on the EUP, f32).
    a = jnp.dot(a.astype(w3_ref.dtype), w3_ref[...],
                preferred_element_type=jnp.float32) + b3_ref[...]
    o_ref[...] = (max_action * jnp.tanh(a)).astype(o_ref.dtype)


def actor_forward(state, params, max_action, *, block_m=256,
                  compute_dtype=jnp.bfloat16):
    """Run the Actor MLP as a batch-tiled Pallas kernel.

    state:  [B, state_dim] float32
    params: dict with w1 [S,H1], b1 [1,H1], w2 [H1,H2], b2 [1,H2],
            w3 [H2,A], b3 [1,A]  (all float32)
    """
    w1, b1, w2, b2, w3, b3 = (params["w1"], params["b1"], params["w2"],
                              params["b2"], params["w3"], params["b3"])
    B, S = state.shape
    H1 = w1.shape[1]
    H2 = w2.shape[1]
    A = w3.shape[1]

    # ---- Lane-dense output: pad action dim up to a multiple of 128. ----
    A_pad = _round_up(A, 128)
    if A_pad != A:
        w3 = jnp.pad(w3, ((0, 0), (0, A_pad - A)))
        b3 = jnp.pad(b3, ((0, 0), (0, A_pad - A)))

    # ---- Cast weights/state to the MXU compute dtype (biases stay f32). ----
    # NOTE: in a real training/eval loop this cast/pad should be hoisted out
    # of the per-step path (params change only once per optimizer step).
    w1c = w1.astype(compute_dtype)
    w2c = w2.astype(compute_dtype)
    w3c = w3.astype(compute_dtype)
    state_c = state.astype(compute_dtype)

    # ---- Batch tiling: multiple of 8 sublanes, capped at block_m. ----
    tm = min(block_m, max(8, _round_up(B, 8)))
    B_pad = _round_up(B, tm)
    if B_pad != B:
        state_c = jnp.pad(state_c, ((0, B_pad - B), (0, 0)))
    grid = (B_pad // tm,)

    # Resident (constant-index) specs for weights & biases; tiled batch specs
    # for state/output so Pallas double-buffers their DMAs.
    resident = lambda arr: pl.BlockSpec(arr.shape, lambda i: (0, 0))
    in_specs = [
        pl.BlockSpec((tm, S), lambda i: (i, 0)),      # state tile
        resident(w1c), resident(b1),
        resident(w2c), resident(b2),
        resident(w3c), resident(b3),
    ]
    out_specs = pl.BlockSpec((tm, A_pad), lambda i: (i, 0))

    # Advisory cost estimate for XLA's scheduler.
    flops = 2 * B_pad * (S * H1 + H1 * H2 + H2 * A_pad)
    bytes_accessed = (
        state_c.size * state_c.dtype.itemsize
        + sum(a.size * a.dtype.itemsize for a in (w1c, b1, w2c, b2, w3c, b3))
        + B_pad * A_pad * 4)
    cost = pl.CostEstimate(flops=int(flops),
                           transcendentals=int(B_pad * A_pad),
                           bytes_accessed=int(bytes_accessed))

    kernel = functools.partial(_actor_kernel, max_action=float(max_action))
    out = pl.pallas_call(
        kernel,
        out_shape=jax.ShapeDtypeStruct((B_pad, A_pad), jnp.float32),
        grid=grid,
        in_specs=in_specs,
        out_specs=out_specs,
        compiler_params=pltpu.CompilerParams(
            dimension_semantics=("parallel",)),
        cost_estimate=cost,
    )(state_c, w1c, b1, w2c, b2, w3c, b3)

    # Strip batch / action-lane padding.
    return out[:B, :A]


def init_actor_params(key, state_dim, action_dim, hidden_dim=(256, 256)):
    """Deterministic PyTorch-style (uniform +/- 1/sqrt(fan_in)) init."""
    def linear(k, fan_in, fan_out):
        kw, kb = jax.random.split(k)
        bound = 1.0 / jnp.sqrt(fan_in)
        w = jax.random.uniform(kw, (fan_in, fan_out), jnp.float32,
                               -bound, bound)
        b = jax.random.uniform(kb, (1, fan_out), jnp.float32, -bound, bound)
        return w, b

    k1, k2, k3 = jax.random.split(key, 3)
    w1, b1 = linear(k1, state_dim, hidden_dim[0])
    w2, b2 = linear(k2, hidden_dim[0], hidden_dim[1])
    w3, b3 = linear(k3, hidden_dim[1], action_dim)
    return {"w1": w1, "b1": b1, "w2": w2, "b2": b2, "w3": w3, "b3": b3}


def actor_reference(state, params, max_action):
    a = jnp.maximum(state @ params["w1"] + params["b1"], 0.0)
    a = jnp.maximum(a @ params["w2"] + params["b2"], 0.0)
    return max_action * jnp.tanh(a @ params["w3"] + params["b3"])


if __name__ == "__main__":
    # Small shapes consistent with the module: state_dim=16, hidden=(32, 32),
    # action_dim=4, max_action=1.0
    STATE_DIM, ACTION_DIM = 16, 4
    HIDDEN = (32, 32)
    MAX_ACTION = 1.0

    key = jax.random.PRNGKey(0)
    k_params, k_state1, k_state2 = jax.random.split(key, 3)
    params = init_actor_params(k_params, STATE_DIM, ACTION_DIM, HIDDEN)

    # --- Test 1: f32 compute path, batch=8 (single grid step). ---
    state = jax.random.normal(k_state1, (8, STATE_DIM), jnp.float32)
    out_f32 = jax.block_until_ready(
        actor_forward(state, params, MAX_ACTION, compute_dtype=jnp.float32))
    ref = actor_reference(state, params, MAX_ACTION)
    assert out_f32.shape == (8, ACTION_DIM)
    assert jnp.allclose(out_f32, ref, atol=1e-5, rtol=1e-5)

    # --- Test 2: default bf16 compute path, ragged batch=37 with a small
    #     batch tile so the grid pipeline (multiple steps + padding) runs. ---
    state2 = jax.random.normal(k_state2, (37, STATE_DIM), jnp.float32)
    out_bf16 = jax.block_until_ready(
        actor_forward(state2, params, MAX_ACTION, block_m=16))
    ref2 = actor_reference(state2, params, MAX_ACTION)
    assert out_bf16.shape == (37, ACTION_DIM)
    assert jnp.allclose(out_bf16, ref2, atol=3e-2, rtol=0.0)

    print("KERNEL_OK")
</pallas_src>

<mosaic_0001>
module attributes {stable_mosaic.version = 11 : i64} {
  func.func @_actor_kernel(%arg0: i32, %arg1: memref<8x16xf32, #tpu.memory_space<vmem>>, %arg2: memref<16x32xf32, #tpu.memory_space<vmem>>, %arg3: memref<1x32xf32, #tpu.memory_space<vmem>>, %arg4: memref<32x32xf32, #tpu.memory_space<vmem>>, %arg5: memref<1x32xf32, #tpu.memory_space<vmem>>, %arg6: memref<32x128xf32, #tpu.memory_space<vmem>>, %arg7: memref<1x128xf32, #tpu.memory_space<vmem>>, %arg8: memref<8x128xf32, #tpu.memory_space<vmem>>) attributes {dimension_semantics = [#tpu.dimension_semantics<parallel>], iteration_bounds = array<i64: 1>, scalar_prefetch = 0 : i64, scratch_operands = 0 : i64, tpu.core_type = #tpu.core_type<tc>, window_params = [{transform_indices = @transform_0, window_bounds = array<i64: 8, 16>}, {pipeline_mode = #tpu.pipeline_mode<synchronous>, transform_indices = @transform_1, window_bounds = array<i64: 16, 32>}, {pipeline_mode = #tpu.pipeline_mode<synchronous>, transform_indices = @transform_2, window_bounds = array<i64: 1, 32>}, {pipeline_mode = #tpu.pipeline_mode<synchronous>, transform_indices = @transform_3, window_bounds = array<i64: 32, 32>}, {pipeline_mode = #tpu.pipeline_mode<synchronous>, transform_indices = @transform_4, window_bounds = array<i64: 1, 32>}, {pipeline_mode = #tpu.pipeline_mode<synchronous>, transform_indices = @transform_5, window_bounds = array<i64: 32, 128>}, {pipeline_mode = #tpu.pipeline_mode<synchronous>, transform_indices = @transform_6, window_bounds = array<i64: 1, 128>}, {transform_indices = @transform_7, window_bounds = array<i64: 8, 128>}]} {
    %c0 = arith.constant 0 : index
    %c0_0 = arith.constant 0 : index
    %0 = vector.load %arg1[%c0, %c0_0] : memref<8x16xf32, #tpu.memory_space<vmem>>, vector<8x16xf32>
    %c0_1 = arith.constant 0 : index
    %c0_2 = arith.constant 0 : index
    %1 = vector.load %arg2[%c0_1, %c0_2] : memref<16x32xf32, #tpu.memory_space<vmem>>, vector<16x32xf32>
    %cst = arith.constant dense<0.000000e+00> : vector<8x32xf32>
    %2 = tpu.matmul %0, %1, %cst {dimension_numbers = #tpu.dot_dimension_numbers<[1], [0], [0], [1], [0, 0, 1, 1], [], []>} : vector<8x16xf32>, vector<16x32xf32>, vector<8x32xf32> -> vector<8x32xf32>
    %c0_3 = arith.constant 0 : index
    %c0_4 = arith.constant 0 : index
    %3 = vector.load %arg3[%c0_3, %c0_4] : memref<1x32xf32, #tpu.memory_space<vmem>>, vector<1x32xf32>
    %4 = vector.broadcast %3 : vector<1x32xf32> to vector<8x32xf32>
    %5 = arith.addf %2, %4 : vector<8x32xf32>
    %cst_5 = arith.constant 0.000000e+00 : f32
    %6 = vector.broadcast %cst_5 : f32 to vector<8x32xf32>
    %7 = arith.maximumf %5, %6 : vector<8x32xf32>
    %c0_6 = arith.constant 0 : index
    %c0_7 = arith.constant 0 : index
    %8 = vector.load %arg4[%c0_6, %c0_7] : memref<32x32xf32, #tpu.memory_space<vmem>>, vector<32x32xf32>
    %cst_8 = arith.constant dense<0.000000e+00> : vector<8x32xf32>
    %9 = tpu.matmul %7, %8, %cst_8 {dimension_numbers = #tpu.dot_dimension_numbers<[1], [0], [0], [1], [0, 0, 1, 1], [], []>} : vector<8x32xf32>, vector<32x32xf32>, vector<8x32xf32> -> vector<8x32xf32>
    %c0_9 = arith.constant 0 : index
    %c0_10 = arith.constant 0 : index
    %10 = vector.load %arg5[%c0_9, %c0_10] : memref<1x32xf32, #tpu.memory_space<vmem>>, vector<1x32xf32>
    %11 = vector.broadcast %10 : vector<1x32xf32> to vector<8x32xf32>
    %12 = arith.addf %9, %11 : vector<8x32xf32>
    %cst_11 = arith.constant 0.000000e+00 : f32
    %13 = vector.broadcast %cst_11 : f32 to vector<8x32xf32>
    %14 = arith.maximumf %12, %13 : vector<8x32xf32>
    %c0_12 = arith.constant 0 : index
    %c0_13 = arith.constant 0 : index
    %15 = vector.load %arg6[%c0_12, %c0_13] : memref<32x128xf32, #tpu.memory_space<vmem>>, vector<32x128xf32>
    %cst_14 = arith.constant dense<0.000000e+00> : vector<8x128xf32>
    %16 = tpu.matmul %14, %15, %cst_14 {dimension_numbers = #tpu.dot_dimension_numbers<[1], [0], [0], [1], [0, 0, 1, 1], [], []>} : vector<8x32xf32>, vector<32x128xf32>, vector<8x128xf32> -> vector<8x128xf32>
    %c0_15 = arith.constant 0 : index
    %c0_16 = arith.constant 0 : index
    %17 = vector.load %arg7[%c0_15, %c0_16] : memref<1x128xf32, #tpu.memory_space<vmem>>, vector<1x128xf32>
    %18 = vector.broadcast %17 : vector<1x128xf32> to vector<8x128xf32>
    %19 = arith.addf %16, %18 : vector<8x128xf32>
    %20 = math.tanh %19 : vector<8x128xf32>
    %cst_17 = arith.constant 1.000000e+00 : f32
    %21 = vector.broadcast %cst_17 : f32 to vector<8x128xf32>
    %22 = arith.mulf %21, %20 : vector<8x128xf32>
    %c0_18 = arith.constant 0 : index
    %c0_19 = arith.constant 0 : index
    %23 = vector.load %arg8[%c0_18, %c0_19] : memref<8x128xf32, #tpu.memory_space<vmem>>, vector<8x128xf32>
    tpu.vector_store %arg8[%c0_18, %c0_19], %22 {strides = array<i32>} : memref<8x128xf32, #tpu.memory_space<vmem>>, vector<8x128xf32>,
    return
  }
  func.func @transform_0(%arg0: i32) -> (i32, i32) {
    %c0_i32 = arith.constant 0 : i32
    %c0_i32_0 = arith.constant 0 : i32
    return %arg0, %c0_i32 : i32, i32
  }
  func.func @transform_1(%arg0: i32) -> (i32, i32) {
    %c0_i32 = arith.constant 0 : i32
    %c0_i32_0 = arith.constant 0 : i32
    %c0_i32_1 = arith.constant 0 : i32
    return %c0_i32, %c0_i32_0 : i32, i32
  }
  func.func @transform_2(%arg0: i32) -> (i32, i32) {
    %c0_i32 = arith.constant 0 : i32
    %c0_i32_0 = arith.constant 0 : i32
    %c0_i32_1 = arith.constant 0 : i32
    return %c0_i32, %c0_i32_0 : i32, i32
  }
  func.func @transform_3(%arg0: i32) -> (i32, i32) {
    %c0_i32 = arith.constant 0 : i32
    %c0_i32_0 = arith.constant 0 : i32
    %c0_i32_1 = arith.constant 0 : i32
    return %c0_i32, %c0_i32_0 : i32, i32
  }
  func.func @transform_4(%arg0: i32) -> (i32, i32) {
    %c0_i32 = arith.constant 0 : i32
    %c0_i32_0 = arith.constant 0 : i32
    %c0_i32_1 = arith.constant 0 : i32
    return %c0_i32, %c0_i32_0 : i32, i32
  }
  func.func @transform_5(%arg0: i32) -> (i32, i32) {
    %c0_i32 = arith.constant 0 : i32
    %c0_i32_0 = arith.constant 0 : i32
    %c0_i32_1 = arith.constant 0 : i32
    return %c0_i32, %c0_i32_0 : i32, i32
  }
  func.func @transform_6(%arg0: i32) -> (i32, i32) {
    %c0_i32 = arith.constant 0 : i32
    %c0_i32_0 = arith.constant 0 : i32
    %c0_i32_1 = arith.constant 0 : i32
    return %c0_i32, %c0_i32_0 : i32, i32
  }
  func.func @transform_7(%arg0: i32) -> (i32, i32) {
    %c0_i32 = arith.constant 0 : i32
    %c0_i32_0 = arith.constant 0 : i32
    return %arg0, %c0_i32 : i32, i32
  }
}

</mosaic_0001>

<bundles_post_ra>
// kernel: tpu_custom_call.1
= control target key start
LH: loop header
LB: loop body
LE: loop exit
PB: predicated region body
PF: predicated region fallthrough
CT: control target
= control target key end

     0   :  { %12 = vsyncpa [#allocation3], 0  ;;  %s419_s0 = inlined_call_operand.hbm [shape: f32[8,16], index: 0, kind: input, shape index: {}]   ;;  %s420_s1 = inlined_call_operand.hbm [shape: f32[16,32], index: 1, kind: input, shape index: {}]   ;;  %s421_s2 = inlined_call_operand.vmem [shape: f32[1,32], index: 2, kind: input, shape index: {}]   ;;  %s422_s3 = inlined_call_operand.hbm [shape: f32[32,32], index: 3, kind: input, shape index: {}]   ;;  %s423_s4 = inlined_call_operand.vmem [shape: f32[1,32], index: 4, kind: input, shape index: {}]   ;;  %s424_s5 = inlined_call_operand.hbm [shape: f32[32,128], index: 5, kind: input, shape index: {}]   ;;  %s425_s6 = inlined_call_operand.vmem [shape: f32[1,128], index: 6, kind: input, shape index: {}]   ;;  %s426_s7 = inlined_call_operand.hbm [shape: f32[8,128], index: 7, kind: output, shape index: {}]  }
   0x1   :  { %13 = vsyncpa [#allocation6], 0 }
   0x2   :  { %14 = vsyncpa [#allocation9], 0  ;;  %s31_s26 = sshll.u32 %s420_s1, 4  ;;  %s32_s26 = int_to_ptr.hbm [resolvable:$true] %s31_s26 }
   0x3   :  { %15 = vsyncpa [#allocation4], 0  ;;  %s348_s27 = smov [#allocation5]   ;;  %s21_s8 = sshll.u32 %s419_s0, 4  ;;  %s22_s8 = int_to_ptr.hbm [resolvable:$true] %s21_s8 }
   0x4   :  { %s33_s28 = sshll.u32 %s348_s27, 4  ;;  %s349_s9 = smov 128   ;;  %s34_s28 = int_to_ptr.vmem [resolvable:$true] %s33_s28 }
   0x5   :  { %s350_s10 = smov 8   ;;  %s351_s11 = smov [#allocation2]  }
   0x6   :  { %39 = dma.hbm_to_vmem [thread:$0]  %s32_s26, 256, %s34_s28, [#allocation6], %s349_s9, %s349_s9, %s350_s10  }
   0x7   :  { %s23_s12 = sshll.u32 %s351_s11, 4  ;;  %s46_s15 = sshll.u32 %s422_s3, 4  ;;  %s24_s12 = int_to_ptr.vmem [resolvable:$true] %s23_s12  ;;  %s47_s15 = int_to_ptr.hbm [resolvable:$true] %s46_s15 }
   0x8   :  { %26 = dma.hbm_to_vmem [thread:$0]  %s22_s8, 128, %s24_s12, [#allocation3]  }
   0x9   :  { %s61_s17 = sshll.u32 %s424_s5, 4  ;;  %s352_s18 = smov [#allocation7]   ;;  %s62_s17 = int_to_ptr.hbm [resolvable:$true] %s61_s17 }
   0xa   :  { %s48_s19 = sshll.u32 %s352_s18, 4  ;;  %s353_s0 = smov [#allocation8]   ;;  %s49_s19 = int_to_ptr.vmem [resolvable:$true] %s48_s19 }
   0xb   :  { %54 = dma.hbm_to_vmem [thread:$0]  %s47_s15, 512, %s49_s19, [#allocation6], %s349_s9, %s349_s9, %s350_s10  }
   0xc   :  { %s63_s20 = sshll.u32 %s353_s0, 4  ;;  %s64_s20 = int_to_ptr.vmem [resolvable:$true] %s63_s20 }
   0xd   :  { %69 = dma.hbm_to_vmem [thread:$0]  %s62_s17, 512, %s64_s20, [#allocation9], %s349_s9, %s349_s9, %s350_s10  }
   0xe   :  { %340 = dma.done.wait [#allocation3], 128  }
   0xf   :  { %341 = vsyncadd [#allocation3], 4294967168 }
  0x10   :  { %342 = dma.done.wait [#allocation6], 768  }
  0x11   :  { %343 = vsyncadd [#allocation6], 4294966528 }
  0x12   :  { %344 = dma.done.wait [#allocation9], 512  }
  0x13   :  { %345 = vsyncadd [#allocation9], 4294966784  ;;  %v90_v0 = vld [vmem:[#allocation5 + $0x8] sm:$0xff]  ;;  %v89_v1 = vld [vmem:[#allocation5] sm:$0xff]  ;;  %vm95_vm0 = vcmask 130048   ;;  %vm128_vm1 = vcmask 261120  }
  0x14   :  { %113 = vmatpush.msra.mxu0 %v90_v0  ;;  %v88_v2 = vld [vmem:[#allocation2] sm:$0xff]  ;;  %v123_v3 = vld [vmem:[#allocation7 + $0x18] sm:$0xff]  ;;  %v122_v4 = vld [vmem:[#allocation7 + $0x10] sm:$0xff]  ;;  %s354_s24 = smov [#allocation10]   ;;  %s193_s28 = sshll.u32 %s426_s7, 4  ;;  %s194_s28 = int_to_ptr.hbm [resolvable:$true] %s193_s28 }
  0x15   :  { %144 = vmatpush.msra.mxu1 %v123_v3  ;;  %v121_v5 = vld [vmem:[#allocation7 + $0x8] sm:$0xff]  ;;  %v120_v6 = vld [vmem:[#allocation7] sm:$0xff]  ;;  %v156_v7 = vld [vmem:[#allocation8 + $0x18] sm:$0xff]  ;;  %s191_s25 = sshll.u32 %s354_s24, 4  ;;  %s192_s25 = int_to_ptr.vmem [resolvable:$true] %s191_s25 }
  0x16   :  { %114 = vmatpush.msra.mxu0 %v89_v1  ;;  %176 = vmatpush.msra.mxu2 %v156_v7  ;;  %v215_v8 = vld [vmem:[%s421_s2] ss:$0 sm:$0xff]  ;;  %v155_v12 = vld [vmem:[#allocation8 + $0x10] sm:$0xff]  ;;  %v153_v14 = vld [vmem:[#allocation8] sm:$0xff] }
  0x17   :  { %205 = vmatmul.msk.f32.vlgmr.msra.gmra.mxu0 %vm95_vm0, %v88_v2  ;;  %145 = vmatpush.msra.mxu1 %v122_v4  ;;  %v154_v13 = vld [vmem:[#allocation8 + $0x8] sm:$0xff] }
  0x18   :  { %177 = vmatpush.msra.mxu2 %v155_v12  ;;  %v216_v15 = vld [vmem:[%s423_s4] ss:$0 sm:$0xff] }
  0x19   :  { %146 = vmatpush.msra.mxu1 %v121_v5  ;;  %v217_v19 = vld [vmem:[%s425_s6] ss:$0 sm:$0xff] }
  0x1a   :  { %178 = vmatpush.msra.mxu2 %v154_v13 }
  0x1b   :  { %147 = vmatpush.msra.mxu1 %v120_v6 }
  0x1c   :  { %179 = vmatpush.msra.mxu2 %v153_v14 }
  0x94   :  { %v116_v9 = vpop.f32.mrf.mxu0 }
  0x95   :  { %v117_v10 = vadd.f32 %v215_v8, %v116_v9 }
  0x97   :  { %v119_v11 = vmax.f32 %v117_v10, 0.0 }
  0x99   :  { %206 = vmatmul.msk.f32.vlgmr.msra.gmra.mxu1 %vm128_vm1, %v119_v11 }
 0x116   :  { %v149_v16 = vpop.f32.mrf.mxu1 }
 0x117   :  { %v150_v17 = vadd.f32 %v216_v15, %v149_v16 }
 0x119   :  { %v152_v18 = vmax.f32 %v150_v17, 0.0 }
 0x11b   :  { %207 = vmatmul.msk.f32.vlgmr.msra.gmra.mxu2 %vm128_vm1, %v152_v18 }
 0x19e   :  { %v181_v20 = vpop.f32.mrf.mxu2 }
 0x19f   :  { %v182_v21 = vadd.f32 %v217_v19, %v181_v20 }
 0x1a1   :  { %218 = vtanh.f32 %v182_v21 }
 0x1a7   :  { %v219_v22 = vpop.eup %218 }
 0x1a8   :  { %185 = vst [vmem:[#allocation10] sm:$0xff] %v219_v22 }
 0x1a9   :  { %196 = dma.vmem_to_hbm [thread:$0]  %s192_s25, 128, %s194_s28, [#allocation4]  }
 0x1aa   :  { %346 = dma.done.wait [#allocation4], 128  }
 0x1ab   :  { %347 = vsyncadd [#allocation4], 4294967168 }
 0x1ac   :  { %201 = vsyncpa [#allocation3], 1 }
 0x1ad   :  { %202 = vsyncpa [#allocation6], 1 }
 0x1ae   :  { %203 = vsyncpa [#allocation9], 1 }
 0x1af   :  { %204 = vsyncpa [#allocation4], 1 }

</bundles_post_ra>
